<compile_context>
chip_gen: v7x
topology: tpu7x:2x2x1
jax: 0.10.0
libtpu: 0.0.40
codegen_flags: <defaults>
</compile_context>

<pallas_src>
import functools

import jax
import jax.numpy as jnp
from jax.experimental import pallas as pl
from jax.experimental.pallas import tpu as pltpu

EPS = 1e-5
LANE = 128
SUBLANE = 8


def _round_up(x, m):
    return (x + m - 1) // m * m


def _vmem_capacity_bytes():
    try:
        return int(pltpu.get_tpu_info().vmem_capacity_bytes)
    except Exception:
        return 64 << 20   # conservative default (v7x per-TC VMEM)


# ----------------------------- kernel bodies ---------------------------------
def _conv1_sc_stats_kernel(cp, xt_ref, w1_ref, wsc_ref, h1_ref, sc_ref, st_ref):
    """Pass A: conv1 (taps folded into K) + 1x1 shortcut conv + per-tile
    (sum, sum-of-squares) partial stats for bn1 / bn_sc."""
    xt = xt_ref[...]                                             # (TR, 3*Cp)
    h1 = jnp.dot(xt, w1_ref[...], preferred_element_type=jnp.float32)
    sc = jnp.dot(xt[:, cp:2 * cp], wsc_ref[...],
                 preferred_element_type=jnp.float32)
    h1_ref[...] = h1.astype(h1_ref.dtype)
    sc_ref[...] = sc.astype(sc_ref.dtype)
    z = jnp.zeros((1, h1.shape[1]), jnp.float32)
    st_ref[0] = jnp.concatenate(
        [jnp.sum(h1, axis=0, keepdims=True),
         jnp.sum(h1 * h1, axis=0, keepdims=True),
         jnp.sum(sc, axis=0, keepdims=True),
         jnp.sum(sc * sc, axis=0, keepdims=True),
         z, z, z, z], axis=0)                                    # (8, Cq)


def _conv2_stats_kernel(seqs_per_tile, lp, lout, n_true, mm_dtype,
                        h1_ref, s1_ref, t1_ref, w2p_ref, w2c_ref, w2n_ref,
                        h2_ref, st_ref):
    """Pass B: bn1+relu (scale/shift precomputed on host), conv2 as three
    MXU-accumulated dots with roll-based neighbours, bn2 partial stats
    (padded rows / padded batch sequences masked out of the sums)."""
    tr = h1_ref.shape[0]
    tile = pl.program_id(0)
    a1 = jnp.maximum(
        h1_ref[...].astype(jnp.float32) * s1_ref[...] + t1_ref[...], 0.0)

    # In-kernel row-position / validity masks (no (R,1) HBM mask buffers).
    # Tiles hold whole Lp-padded sequences, so position-in-sequence depends on
    # the local row index only.
    pos = jax.lax.broadcasted_iota(
        jnp.int32, (seqs_per_tile, lp, 1), 1).reshape(tr, 1)
    seq = tile * seqs_per_tile + jax.lax.broadcasted_iota(
        jnp.int32, (seqs_per_tile, lp, 1), 0).reshape(tr, 1)
    m_prev = (pos != 0).astype(jnp.float32)
    m_next = (pos != lout - 1).astype(jnp.float32)
    valid = jnp.logical_and(pos < lout, seq < n_true).astype(jnp.float32)

    # conv2 (k=3, stride=1, pad=1): neighbour rows via XLU roll + boundary
    # masks; tile edges coincide with sequence edges -> no cross-tile halo.
    a_c = a1.astype(mm_dtype)
    a_p = (pltpu.roll(a1, shift=1, axis=0) * m_prev).astype(mm_dtype)
    a_n = (pltpu.roll(a1, shift=tr - 1, axis=0) * m_next).astype(mm_dtype)
    h2 = jnp.dot(a_p, w2p_ref[...], preferred_element_type=jnp.float32)
    h2 = h2 + jnp.dot(a_c, w2c_ref[...], preferred_element_type=jnp.float32)
    h2 = h2 + jnp.dot(a_n, w2n_ref[...], preferred_element_type=jnp.float32)
    h2_ref[...] = h2.astype(h2_ref.dtype)

    h2v = h2 * valid                       # pad rows excluded from bn2 stats
    z = jnp.zeros((1, h2.shape[1]), jnp.float32)
    st_ref[0] = jnp.concatenate(
        [jnp.sum(h2v, axis=0, keepdims=True),
         jnp.sum(h2v * h2v, axis=0, keepdims=True),
         z, z, z, z, z, z], axis=0)


def _residual_kernel(h2_ref, sc_ref, s2_ref, ssc_ref, bias_ref, out_ref):
    """Pass C: bn2/bn_sc normalize (folded scale/shift) + residual add + relu."""
    out_ref[...] = jnp.maximum(
        h2_ref[...].astype(jnp.float32) * s2_ref[...]
        + sc_ref[...].astype(jnp.float32) * ssc_ref[...]
        + bias_ref[...], 0.0)


# ------------------------------- wrapper --------------------------------------
def basic_block_pallas(x_ncl, params, stride, *, mm_dtype=jnp.bfloat16,
                       target_tile_rows=None):
    """x_ncl: (N, Cin, L) float32 (PyTorch Conv1d layout) -> (N, Cout, Lout).

    Projection-shortcut variant of BasicBlock (params include wsc/gsc/bsc,
    i.e. stride != 1 or Cin != Cout)."""
    N, Cin, L = x_ncl.shape
    Cout = params["w1"].shape[0]
    Lout = (L + 2 - 3) // stride + 1
    Cp = _round_up(Cin, LANE)        # padded input channels (lane-dense)
    Cq = _round_up(Cout, LANE)       # padded output channels (lane-dense)
    f32 = jnp.float32
    isz = jnp.dtype(mm_dtype).itemsize

    # ---- VMEM-aware row tiling: whole sublane-padded sequences per tile -----
    vmem_cap = _vmem_capacity_bytes()        # 64 MiB (v7x) / 128 MiB (v5e/v6e)
    Lp = _round_up(Lout, SUBLANE)
    # per-row footprint: double-buffered tile IO (worst pass) + f32 temporaries
    per_row = max(2 * isz * (3 * Cp + 2 * Cq) + 12 * Cq,
                  4 * isz * Cq + 24 * Cq)
    if target_tile_rows is None:
        target_tile_rows = 2048 if vmem_cap > (96 << 20) else 1024
    rows_cap = max(Lp, min(target_tile_rows, (vmem_cap // 4) // per_row))
    # TODO(synk): very long sequences (Lp * per_row > VMEM budget) need
    # halo-based sub-sequence tiling; whole-sequence tiles are what make the
    # in-kernel rolls halo-free and the tile axis trivially "parallel".
    S = max(1, min(rows_cap // Lp, N))        # sequences per tile
    Np = _round_up(N, S)                      # batch padded to a tile multiple
    TR = S * Lp                               # rows per tile (multiple of 8)
    num_tiles = Np // S
    Rp = Np * Lp
    count = float(N * Lout)                   # true BN population size

    w_bytes = (4 * Cp * Cq + 3 * Cq * Cq) * isz
    vmem_limit = int(min(vmem_cap * 3 // 4,
                         max(32 << 20, TR * per_row + 2 * w_bytes + (4 << 20))))
    cparams = pltpu.CompilerParams(
        dimension_semantics=("parallel",),    # row tiles shard across TCs (v7x)
        vmem_limit_bytes=vmem_limit)

    # ---- activations: NCL -> NLC, pad channels / batch / length, fold the
    #      three strided conv1 taps into the channel axis (one wide-K matmul).
    x_nlc = jnp.transpose(x_ncl, (0, 2, 1)).astype(f32)              # (N,L,Cin)
    x_nlc = jnp.pad(x_nlc, ((0, Np - N), (1, 1), (0, Cp - Cin)))     # (Np,L+2,Cp)
    idx = stride * jnp.arange(Lout)
    xt = jnp.concatenate([x_nlc[:, idx + k, :] for k in range(3)], axis=-1)
    xt = jnp.pad(xt, ((0, 0), (0, Lp - Lout), (0, 0)))               # (Np,Lp,3Cp)
    xt = xt.reshape(Rp, 3 * Cp).astype(mm_dtype)
    # TODO(synk): for stride==1 blocks, skip the tap triplication and build the
    # conv1 neighbours in-kernel with pltpu.roll (3x less conv1 input traffic).

    # ---- weights: PyTorch (Cout, Cin, K) -> lane-dense folded (K*Cin_p, Cq) --
    def fold_w(w, cin_p):
        k = w.shape[2]
        wt = jnp.transpose(w, (2, 1, 0)).astype(f32)                 # (K,Cin,Cout)
        wt = jnp.pad(wt, ((0, 0), (0, cin_p - w.shape[1]),
                          (0, Cq - w.shape[0])))
        return wt.reshape(k * cin_p, Cq).astype(mm_dtype)

    w1 = fold_w(params["w1"], Cp)                                    # (3*Cp, Cq)
    wsc = fold_w(params["wsc"], Cp)                                  # (Cp,  Cq)
    w2t = jnp.transpose(params["w2"], (2, 1, 0)).astype(f32)         # (3,Cin2,Cout)
    w2t = jnp.pad(w2t, ((0, 0), (0, Cq - w2t.shape[1]),
                        (0, Cq - w2t.shape[2])))
    w2p, w2c, w2n = (w2t[k].astype(mm_dtype) for k in range(3))      # (Cq,Cq) x3
    # TODO(synk): on v6e/v7x (256-wide MXU), conv1 and the 1x1 shortcut could be
    # fused into one N=2*Cq matmul; kept separate (strictly +50% work on v5e).

    def pad_vec(v):
        return jnp.pad(v.astype(f32), (0, Cq - v.shape[0]))

    g1, b1 = pad_vec(params["g1"]), pad_vec(params["b1"])
    g2, b2 = pad_vec(params["g2"]), pad_vec(params["b2"])
    gsc, bsc = pad_vec(params["gsc"]), pad_vec(params["bsc"])

    def bn_scale_shift(s, q, gamma, beta):
        mean = s / count
        var = jnp.maximum(q / count - mean * mean, 0.0)   # biased training var
        scale = gamma * jax.lax.rsqrt(var + EPS)
        shift = beta - mean * scale
        return scale.reshape(1, Cq), shift.reshape(1, Cq)

    def rows(width):
        return pl.BlockSpec((TR, width), lambda i: (i, 0))

    def full(arr):
        return pl.BlockSpec(arr.shape, lambda i: (0,) * arr.ndim)

    vec_spec = pl.BlockSpec((1, Cq), lambda i: (0, 0))
    stat_spec = pl.BlockSpec((1, SUBLANE, Cq), lambda i: (i, 0, 0))
    stat_shape = jax.ShapeDtypeStruct((num_tiles, SUBLANE, Cq), f32)

    # ---- pass A: conv1 + shortcut conv + bn1/bn_sc partial stats ------------
    h1_raw, sc_raw, stats_a = pl.pallas_call(
        functools.partial(_conv1_sc_stats_kernel, Cp),
        grid=(num_tiles,),
        in_specs=[rows(3 * Cp), full(w1), full(wsc)],
        out_specs=[rows(Cq), rows(Cq), stat_spec],
        out_shape=[jax.ShapeDtypeStruct((Rp, Cq), mm_dtype),
                   jax.ShapeDtypeStruct((Rp, Cq), mm_dtype),
                   stat_shape],
        compiler_params=cparams,
        cost_estimate=pl.CostEstimate(
            flops=int(2 * Rp * Cq * (3 * Cp + Cp) + 6 * Rp * Cq),
            transcendentals=0,
            bytes_accessed=int(isz * (Rp * 3 * Cp + 2 * Rp * Cq + 4 * Cp * Cq))),
    )(xt, w1, wsc)

    sa = jnp.sum(stats_a, axis=0)                                    # (8, Cq)
    s1v, t1v = bn_scale_shift(sa[0], sa[1], g1, b1)
    sscv, tscv = bn_scale_shift(sa[2], sa[3], gsc, bsc)

    # ---- pass B: bn1+relu, conv2 (3 accumulated dots), bn2 partial stats ----
    h2_raw, stats_b = pl.pallas_call(
        functools.partial(_conv2_stats_kernel, S, Lp, Lout, N, mm_dtype),
        grid=(num_tiles,),
        in_specs=[rows(Cq), vec_spec, vec_spec,
                  full(w2p), full(w2c), full(w2n)],
        out_specs=[rows(Cq), stat_spec],
        out_shape=[jax.ShapeDtypeStruct((Rp, Cq), mm_dtype), stat_shape],
        compiler_params=cparams,
        cost_estimate=pl.CostEstimate(
            flops=int(6 * Rp * Cq * Cq + 16 * Rp * Cq),
            transcendentals=0,
            bytes_accessed=int(isz * (2 * Rp * Cq + 3 * Cq * Cq))),
    )(h1_raw, s1v, t1v, w2p, w2c, w2n)

    sb = jnp.sum(stats_b, axis=0)
    s2v, t2v = bn_scale_shift(sb[0], sb[1], g2, b2)
    bias = t2v + tscv                         # combined bn2 + bn_sc shifts

    # ---- pass C: normalize + residual add + relu -----------------------------
    out2d = pl.pallas_call(
        _residual_kernel,
        grid=(num_tiles,),
        in_specs=[rows(Cq), rows(Cq), vec_spec, vec_spec, vec_spec],
        out_specs=rows(Cq),
        out_shape=jax.ShapeDtypeStruct((Rp, Cq), f32),
        compiler_params=cparams,
        cost_estimate=pl.CostEstimate(
            flops=int(5 * Rp * Cq), transcendentals=0,
            bytes_accessed=int(Rp * Cq * (2 * isz + 4))),
    )(h2_raw, sc_raw, s2v, sscv, bias)

    # TODO(synk): when chaining blocks, keep the padded (Np, Lp, Cq) NLC layout
    # and fuse this slice/transpose into the consumer instead of paying it here.
    # TODO(synk): BatchNorm running_mean/running_var momentum updates (training
    # buffers) are not modeled; they do not affect the forward output.
    out = out2d.reshape(Np, Lp, Cq)[:N, :Lout, :Cout]
    return jnp.transpose(out, (0, 2, 1))                             # (N,Cout,Lout)


# --------------------------- pure-JAX reference --------------------------------
def _conv1d_ref(x, w, stride, padding):
    return jax.lax.conv_general_dilated(
        x, w, window_strides=(stride,), padding=[(padding, padding)],
        dimension_numbers=("NCH", "OIH", "NCH"))


def _bn_ref(x, g, b):
    mean = jnp.mean(x, axis=(0, 2), keepdims=True)
    var = jnp.mean((x - mean) ** 2, axis=(0, 2), keepdims=True)
    return (x - mean) / jnp.sqrt(var + EPS) * g[None, :, None] + b[None, :, None]


def basic_block_ref(x, p, stride):
    out = jax.nn.relu(_bn_ref(_conv1d_ref(x, p["w1"], stride, 1), p["g1"], p["b1"]))
    out = _bn_ref(_conv1d_ref(out, p["w2"], 1, 1), p["g2"], p["b2"])
    sc = _bn_ref(_conv1d_ref(x, p["wsc"], stride, 0), p["gsc"], p["bsc"])
    return jax.nn.relu(out + sc)


if __name__ == "__main__":
    # Small shapes: batch=2, in_channels=4, out_channels=8, length=16, stride=2
    # (stride != 1 and Cin != Cout so the projection shortcut is exercised).
    N, Cin, Cout, L, stride = 2, 4, 8, 16, 2

    key = jax.random.PRNGKey(0)
    ks = jax.random.split(key, 10)
    params = {
        "w1":  0.1 * jax.random.normal(ks[0], (Cout, Cin, 3), jnp.float32),
        "w2":  0.1 * jax.random.normal(ks[1], (Cout, Cout, 3), jnp.float32),
        "wsc": 0.1 * jax.random.normal(ks[2], (Cout, Cin, 1), jnp.float32),
        "g1":  1.0 + 0.1 * jax.random.normal(ks[3], (Cout,), jnp.float32),
        "b1":  0.1 * jax.random.normal(ks[4], (Cout,), jnp.float32),
        "g2":  1.0 + 0.1 * jax.random.normal(ks[5], (Cout,), jnp.float32),
        "b2":  0.1 * jax.random.normal(ks[6], (Cout,), jnp.float32),
        "gsc": 1.0 + 0.1 * jax.random.normal(ks[7], (Cout,), jnp.float32),
        "bsc": 0.1 * jax.random.normal(ks[8], (Cout,), jnp.float32),
    }
    x = jax.random.normal(ks[9], (N, Cin, L), jnp.float32)
    Lout = (L + 2 - 3) // stride + 1

    ref = jax.block_until_ready(basic_block_ref(x, params, stride))

    # Strict correctness gate: f32-matmul mode must match the reference tightly.
    out_f32 = jax.block_until_ready(
        basic_block_pallas(x, params, stride, mm_dtype=jnp.float32))
    assert out_f32.shape == (N, Cout, Lout), out_f32.shape
    err_f32 = float(jnp.max(jnp.abs(out_f32 - ref)))
    assert jnp.allclose(out_f32, ref, rtol=1e-4, atol=1e-4), (
        f"f32 max abs err {err_f32}")

    # Default perf configuration (bf16 MXU operands): bf16-level tolerance.
    out_bf16 = jax.block_until_ready(basic_block_pallas(x, params, stride))
    assert out_bf16.shape == (N, Cout, Lout), out_bf16.shape
    err_bf16 = float(jnp.max(jnp.abs(out_bf16 - ref)))
    assert err_bf16 < 0.15, f"bf16 max abs err {err_bf16}"

    print("KERNEL_OK")
</pallas_src>

<mosaic_0001>
module attributes {stable_mosaic.version = 11 : i64} {
  func.func @_conv1_sc_stats_kernel(%arg0: i32, %arg1: memref<16x384xf32, #tpu.memory_space<vmem>>, %arg2: memref<384x128xf32, #tpu.memory_space<vmem>>, %arg3: memref<128x128xf32, #tpu.memory_space<vmem>>, %arg4: memref<16x128xf32, #tpu.memory_space<vmem>>, %arg5: memref<16x128xf32, #tpu.memory_space<vmem>>, %arg6: memref<1x8x128xf32, #tpu.memory_space<vmem>>) attributes {dimension_semantics = [#tpu.dimension_semantics<parallel>], iteration_bounds = array<i64: 1>, scalar_prefetch = 0 : i64, scratch_operands = 0 : i64, tpu.core_type = #tpu.core_type<tc>, window_params = [{transform_indices = @transform_0, window_bounds = array<i64: 16, 384>}, {pipeline_mode = #tpu.pipeline_mode<synchronous>, transform_indices = @transform_1, window_bounds = array<i64: 384, 128>}, {pipeline_mode = #tpu.pipeline_mode<synchronous>, transform_indices = @transform_2, window_bounds = array<i64: 128, 128>}, {transform_indices = @transform_3, window_bounds = array<i64: 16, 128>}, {transform_indices = @transform_4, window_bounds = array<i64: 16, 128>}, {transform_indices = @transform_5, window_bounds = array<i64: 1, 8, 128>}]} {
    %c0 = arith.constant 0 : index
    %c0_0 = arith.constant 0 : index
    %0 = vector.load %arg1[%c0, %c0_0] : memref<16x384xf32, #tpu.memory_space<vmem>>, vector<16x384xf32>
    %c0_1 = arith.constant 0 : index
    %c0_2 = arith.constant 0 : index
    %1 = vector.load %arg2[%c0_1, %c0_2] : memref<384x128xf32, #tpu.memory_space<vmem>>, vector<384x128xf32>
    %cst = arith.constant dense<0.000000e+00> : vector<16x128xf32>
    %2 = tpu.matmul %0, %1, %cst {dimension_numbers = #tpu.dot_dimension_numbers<[1], [0], [0], [1], [0, 0, 1, 1], [], []>} : vector<16x384xf32>, vector<384x128xf32>, vector<16x128xf32> -> vector<16x128xf32>
    %3 = vector.extract_strided_slice %0 {offsets = [0, 128], sizes = [16, 128], strides = [1, 1]} : vector<16x384xf32> to vector<16x128xf32>
    %c0_3 = arith.constant 0 : index
    %c0_4 = arith.constant 0 : index
    %4 = vector.load %arg3[%c0_3, %c0_4] : memref<128x128xf32, #tpu.memory_space<vmem>>, vector<128x128xf32>
    %cst_5 = arith.constant dense<0.000000e+00> : vector<16x128xf32>
    %5 = tpu.matmul %3, %4, %cst_5 {dimension_numbers = #tpu.dot_dimension_numbers<[1], [0], [0], [1], [0, 0, 1, 1], [], []>} : vector<16x128xf32>, vector<128x128xf32>, vector<16x128xf32> -> vector<16x128xf32>
    %c0_6 = arith.constant 0 : index
    %c0_7 = arith.constant 0 : index
    %6 = vector.load %arg4[%c0_6, %c0_7] : memref<16x128xf32, #tpu.memory_space<vmem>>, vector<16x128xf32>
    tpu.vector_store %arg4[%c0_6, %c0_7], %2 {strides = array<i32>} : memref<16x128xf32, #tpu.memory_space<vmem>>, vector<16x128xf32>,
    %c0_8 = arith.constant 0 : index
    %c0_9 = arith.constant 0 : index
    %7 = vector.load %arg5[%c0_8, %c0_9] : memref<16x128xf32, #tpu.memory_space<vmem>>, vector<16x128xf32>
    tpu.vector_store %arg5[%c0_8, %c0_9], %5 {strides = array<i32>} : memref<16x128xf32, #tpu.memory_space<vmem>>, vector<16x128xf32>,
    %cst_10 = arith.constant 0.000000e+00 : f32
    %8 = vector.broadcast %cst_10 : f32 to vector<1x128xf32>
    %cst_11 = arith.constant dense<0.000000e+00> : vector<128xf32>
    %9 = vector.multi_reduction <add>, %2, %cst_11 [0] : vector<16x128xf32> to vector<128xf32>
    %10 = vector.shape_cast %9 : vector<128xf32> to vector<1x128xf32>
    %11 = arith.mulf %2, %2 : vector<16x128xf32>
    %cst_12 = arith.constant dense<0.000000e+00> : vector<128xf32>
    %12 = vector.multi_reduction <add>, %11, %cst_12 [0] : vector<16x128xf32> to vector<128xf32>
    %13 = vector.shape_cast %12 : vector<128xf32> to vector<1x128xf32>
    %cst_13 = arith.constant dense<0.000000e+00> : vector<128xf32>
    %14 = vector.multi_reduction <add>, %5, %cst_13 [0] : vector<16x128xf32> to vector<128xf32>
    %15 = vector.shape_cast %14 : vector<128xf32> to vector<1x128xf32>
    %16 = arith.mulf %5, %5 : vector<16x128xf32>
    %cst_14 = arith.constant dense<0.000000e+00> : vector<128xf32>
    %17 = vector.multi_reduction <add>, %16, %cst_14 [0] : vector<16x128xf32> to vector<128xf32>
    %18 = vector.shape_cast %17 : vector<128xf32> to vector<1x128xf32>
    %19 = tpu.concatenate %10, %13, %15, %18, %8, %8, %8, %8 in 0 : vector<1x128xf32>, vector<1x128xf32>, vector<1x128xf32>, vector<1x128xf32>, vector<1x128xf32>, vector<1x128xf32>, vector<1x128xf32>, vector<1x128xf32> -> vector<8x128xf32>
    %c0_15 = arith.constant 0 : index
    %c0_16 = arith.constant 0 : index
    %c0_17 = arith.constant 0 : index
    %20 = vector.load %arg6[%c0_15, %c0_16, %c0_17] : memref<1x8x128xf32, #tpu.memory_space<vmem>>, vector<1x8x128xf32>
    %21 = vector.shape_cast %20 : vector<1x8x128xf32> to vector<8x128xf32>
    %22 = vector.shape_cast %19 : vector<8x128xf32> to vector<1x8x128xf32>
    tpu.vector_store %arg6[%c0_15, %c0_16, %c0_17], %22 {strides = array<i32>} : memref<1x8x128xf32, #tpu.memory_space<vmem>>, vector<1x8x128xf32>,
    return
  }
  func.func @transform_0(%arg0: i32) -> (i32, i32) {
    %c0_i32 = arith.constant 0 : i32
    %c0_i32_0 = arith.constant 0 : i32
    return %arg0, %c0_i32 : i32, i32
  }
  func.func @transform_1(%arg0: i32) -> (i32, i32) {
    %c0_i32 = arith.constant 0 : i32
    %c0_i32_0 = arith.constant 0 : i32
    %c0_i32_1 = arith.constant 0 : i32
    return %c0_i32, %c0_i32_0 : i32, i32
  }
  func.func @transform_2(%arg0: i32) -> (i32, i32) {
    %c0_i32 = arith.constant 0 : i32
    %c0_i32_0 = arith.constant 0 : i32
    %c0_i32_1 = arith.constant 0 : i32
    return %c0_i32, %c0_i32_0 : i32, i32
  }
  func.func @transform_3(%arg0: i32) -> (i32, i32) {
    %c0_i32 = arith.constant 0 : i32
    %c0_i32_0 = arith.constant 0 : i32
    return %arg0, %c0_i32 : i32, i32
  }
  func.func @transform_4(%arg0: i32) -> (i32, i32) {
    %c0_i32 = arith.constant 0 : i32
    %c0_i32_0 = arith.constant 0 : i32
    return %arg0, %c0_i32 : i32, i32
  }
  func.func @transform_5(%arg0: i32) -> (i32, i32, i32) {
    %c0_i32 = arith.constant 0 : i32
    %c0_i32_0 = arith.constant 0 : i32
    %c0_i32_1 = arith.constant 0 : i32
    return %arg0, %c0_i32, %c0_i32_0 : i32, i32, i32
  }
}

</mosaic_0001>

<bundles_post_ra>
// kernel: tpu_custom_call.1
= control target key start
LH: loop header
LB: loop body
LE: loop exit
PB: predicated region body
PF: predicated region fallthrough
CT: control target
= control target key end

     0   :  { %11 = vsyncpa [#allocation3], 0  ;;  %s971_s0 = inlined_call_operand.hbm [shape: f32[16,384], index: 0, kind: input, shape index: {}]   ;;  %s972_s1 = inlined_call_operand.hbm [shape: f32[384,128], index: 1, kind: input, shape index: {}]   ;;  %s973_s2 = inlined_call_operand.hbm [shape: f32[128,128], index: 2, kind: input, shape index: {}]   ;;  %s974_s3 = inlined_call_operand.hbm [shape: f32[16,128], index: 3, kind: output, shape index: {0}]   ;;  %s975_s4 = inlined_call_operand.hbm [shape: f32[16,128], index: 4, kind: output, shape index: {1}]   ;;  %s976_s5 = inlined_call_operand.hbm [shape: f32[1,8,128], index: 5, kind: output, shape index: {2}]  }
   0x1   :  { %12 = vsyncpa [#allocation6], 0 }
   0x2   :  { %13 = vsyncpa [#allocation4], 0 }
   0x3   :  { %14 = vsyncpa [#allocation10], 0  ;;  %s843_s18 = smov [#allocation5]   ;;  %s703_s22 = scalar_lea.hbm %s972_s1, 6144 }
   0x4   :  { %s32_s19 = sshll.u32 %s843_s18, 4  ;;  %p704_p0 = scmp.ne.s32.totalorder %s972_s1, %s703_s22  ;;  %s33_s19 = int_to_ptr.vmem [resolvable:$true] %s32_s19 }
   0x5   :  { %p707_p1 = scmp.lt.u32.totalorder %s703_s22, %s972_s1 }
   0x7   :  { %p709_p2 = pnand %p707_p1, %p704_p0 }
   0x9   :  { %712 = shalt.err (!%p709_p2)
}
   0xa   :  { %s713_s27 = scalar_lea.vmem %s33_s19, 6144  ;;  %p718_p4 = scmp.lt.s32.totalorder %s33_s19, %s33_s19 }
   0xb   :  { %p714_p3 = scmp.ne.s32.totalorder %s33_s19, %s713_s27  ;;  %p719_p5 = scmp.lt.s32.totalorder %s713_s27, %s713_s27 }
   0xd   :  { %p720_p6 = por %p719_p5, %p718_p4 }
   0xf   :  { %p721_p7 = pnand %p720_p6, %p714_p3 }
  0x11   :  { %724 = shalt.err (!%p721_p7)
}
  0x12   :  { %s844_s28 = smov 128   ;;  %s845_s29 = smov 8  }
  0x13   :  { %38 = dma.hbm_to_vmem [thread:$0]  %s972_s1, 6144, %s33_s19, [#allocation6], %s844_s28, %s844_s28, %s845_s29  }
  0x14   :  { %s846_s7 = smov [#allocation2]   ;;  %s725_s11 = scalar_lea.hbm %s971_s0, 768 }
  0x15   :  { %s20_s8 = sshll.u32 %s846_s7, 4  ;;  %p726_p8 = scmp.ne.s32.totalorder %s971_s0, %s725_s11  ;;  %s21_s8 = int_to_ptr.vmem [resolvable:$true] %s20_s8 }
  0x16   :  { %p729_p9 = scmp.lt.u32.totalorder %s725_s11, %s971_s0 }
  0x18   :  { %p731_p10 = pnand %p729_p9, %p726_p8 }
  0x1a   :  { %734 = shalt.err (!%p731_p10)
}
  0x1b   :  { %s735_s16 = scalar_lea.vmem %s21_s8, 768  ;;  %p740_p12 = scmp.lt.s32.totalorder %s21_s8, %s21_s8 }
  0x1c   :  { %p736_p11 = scmp.ne.s32.totalorder %s21_s8, %s735_s16  ;;  %p741_p13 = scmp.lt.s32.totalorder %s735_s16, %s735_s16 }
  0x1e   :  { %p742_p0 = por %p741_p13, %p740_p12 }
  0x20   :  { %p743_p1 = pnand %p742_p0, %p736_p11 }
  0x22   :  { %746 = shalt.err (!%p743_p1)
}
  0x23   :  { %s847_s1 = smov 384   ;;  %s848_s17 = smov 24  }
  0x24   :  { %26 = dma.hbm_to_vmem [thread:$0]  %s971_s0, 768, %s21_s8, [#allocation3], %s847_s1, %s847_s1, %s848_s17  }
  0x25   :  { %s849_s20 = smov [#allocation7]   ;;  %s747_s24 = scalar_lea.hbm %s973_s2, 2048 }
  0x26   :  { %s44_s21 = sshll.u32 %s849_s20, 4  ;;  %p748_p2 = scmp.ne.s32.totalorder %s973_s2, %s747_s24  ;;  %s45_s21 = int_to_ptr.vmem [resolvable:$true] %s44_s21 }
  0x27   :  { %p751_p3 = scmp.lt.u32.totalorder %s747_s24, %s973_s2 }
  0x29   :  { %p753_p4 = pnand %p751_p3, %p748_p2 }
  0x2b   :  { %756 = shalt.err (!%p753_p4)
}
  0x2c   :  { %s757_s6 = scalar_lea.vmem %s45_s21, 2048  ;;  %p762_p6 = scmp.lt.s32.totalorder %s45_s21, %s45_s21 }
  0x2d   :  { %p758_p5 = scmp.ne.s32.totalorder %s45_s21, %s757_s6  ;;  %p763_p7 = scmp.lt.s32.totalorder %s757_s6, %s757_s6 }
  0x2f   :  { %p764_p8 = por %p763_p7, %p762_p6 }
  0x31   :  { %p765_p9 = pnand %p764_p8, %p758_p5 }
  0x33   :  { %768 = shalt.err (!%p765_p9)
}
  0x34   :  { %50 = dma.hbm_to_vmem [thread:$0]  %s973_s2, 2048, %s45_s21, [#allocation6], %s844_s28, %s844_s28, %s845_s29  }
  0x35   :  { %835 = dma.done.wait [#allocation3], 768  }
  0x36   :  { %836 = vsyncadd [#allocation3], 4294966528 }
  0x37   :  { %837 = dma.done.wait [#allocation6], 8192  }
  0x38   :  { %838 = vsyncadd [#allocation6], 4294959104  ;;  %v82_v0 = vld [vmem:[#allocation5 + $0x80] sm:$0xff]  ;;  %v83_v1 = vld [vmem:[#allocation5 + $0x88] sm:$0xff]  ;;  %s850_s2 = smov [#allocation8]  }
  0x39   :  { %v66_v2 = vld [vmem:[#allocation5] sm:$0xff]  ;;  %v597_v3 = vpack.c.bf16 %v83_v1, %v82_v0  ;;  %v67_v4 = vld [vmem:[#allocation5 + $0x8] sm:$0xff]  ;;  %v84_v9 = vld [vmem:[#allocation5 + $0x90] sm:$0xff]  ;;  %s411_s8 = sshll.u32 %s850_s2, 4  ;;  %s412_s8 = int_to_ptr.vmem [resolvable:$true] %s411_s8 }
  0x3a   :  { %v98_v5 = vld [vmem:[#allocation5 + $0x100] sm:$0xff]  ;;  %v99_v6 = vld [vmem:[#allocation5 + $0x108] sm:$0xff]  ;;  %v599_v7 = vpack.c.bf16 %v67_v4, %v66_v2  ;;  %v85_v10 = vld [vmem:[#allocation5 + $0x98] sm:$0xff]  ;;  %s769_s9 = scalar_lea.vmem %s412_s8, 256  ;;  %p774_p11 = scmp.lt.s32.totalorder %s412_s8, %s412_s8 }
  0x3b   :  { %v629_v8 = vpack.c.bf16 %v99_v6, %v98_v5  ;;  %v68_v11 = vld [vmem:[#allocation5 + $0x10] sm:$0xff]  ;;  %598 = vmatprep.subr.bf16.mxu0 %v597_v3  ;;  %v601_v12 = vpack.c.bf16 %v85_v10, %v84_v9  ;;  %v69_v13 = vld [vmem:[#allocation5 + $0x18] sm:$0xff]  ;;  %v86_v18 = vld [vmem:[#allocation5 + $0xa0] sm:$0xff]  ;;  %p770_p10 = scmp.ne.s32.totalorder %s412_s8, %s769_s9  ;;  %p775_p12 = scmp.lt.s32.totalorder %s769_s9, %s769_s9 }
  0x3c   :  { %v100_v14 = vld [vmem:[#allocation5 + $0x110] sm:$0xff]  ;;  %v101_v15 = vld [vmem:[#allocation5 + $0x118] sm:$0xff]  ;;  %600 = vmatpush3.bf16.msra.mxu0 %v599_v7  ;;  %v603_v16 = vpack.c.bf16 %v69_v13, %v68_v11  ;;  %v87_v19 = vld [vmem:[#allocation5 + $0xa8] sm:$0xff] }
  0x3d   :  { %630 = vmatprep.subr.bf16.mxu1 %v629_v8  ;;  %v633_v17 = vpack.c.bf16 %v101_v15, %v100_v14  ;;  %v70_v20 = vld [vmem:[#allocation5 + $0x20] sm:$0xff]  ;;  %602 = vmatprep.subr.bf16.mxu0 %v601_v12  ;;  %v605_v21 = vpack.c.bf16 %v87_v19, %v86_v18  ;;  %v71_v22 = vld [vmem:[#allocation5 + $0x28] sm:$0xff]  ;;  %v88_v26 = vld [vmem:[#allocation5 + $0xb0] sm:$0xff]  ;;  %p776_p13 = por %p775_p12, %p774_p11 }
  0x3e   :  { %632 = vmatpush3.bf16.msra.mxu1 %v629_v8  ;;  %v102_v23 = vld [vmem:[#allocation5 + $0x120] sm:$0xff]  ;;  %v103_v24 = vld [vmem:[#allocation5 + $0x128] sm:$0xff]  ;;  %v89_v27 = vld [vmem:[#allocation5 + $0xb8] sm:$0xff]  ;;  %v607_v30 = vpack.c.bf16 %v71_v22, %v70_v20 }
  0x3f   :  { %634 = vmatprep.subr.bf16.mxu1 %v633_v17  ;;  %v637_v25 = vpack.c.bf16 %v103_v24, %v102_v23  ;;  %v104_v28 = vld [vmem:[#allocation5 + $0x130] sm:$0xff]  ;;  %v105_v29 = vld [vmem:[#allocation5 + $0x138] sm:$0xff]  ;;  %v609_v31 = vpack.c.bf16 %v89_v27, %v88_v26  ;;  %v90_v35 = vld [vmem:[#allocation5 + $0xc0] sm:$0xff]  ;;  %p777_p0 = pnand %p776_p13, %p770_p10 }
  0x40   :  { %604 = vmatpush3.bf16.msra.mxu0 %v603_v16  ;;  %v72_v32 = vld [vmem:[#allocation5 + $0x30] sm:$0xff]  ;;  %v73_v33 = vld [vmem:[#allocation5 + $0x38] sm:$0xff]  ;;  %v641_v34 = vpack.c.bf16 %v105_v29, %v104_v28  ;;  %v91_v36 = vld [vmem:[#allocation5 + $0xc8] sm:$0xff] }
  0x41   :  { %606 = vmatprep.subr.bf16.mxu0 %v605_v21  ;;  %v106_v37 = vld [vmem:[#allocation5 + $0x140] sm:$0xff]  ;;  %v107_v38 = vld [vmem:[#allocation5 + $0x148] sm:$0xff]  ;;  %v611_v39 = vpack.c.bf16 %v73_v33, %v72_v32  ;;  %v613_v40 = vpack.c.bf16 %v91_v36, %v90_v35  ;;  %v92_v44 = vld [vmem:[#allocation5 + $0xd0] sm:$0xff] }
  0x42   :  { %636 = vmatpush3.bf16.msra.mxu1 %v633_v17  ;;  %v74_v41 = vld [vmem:[#allocation5 + $0x40] sm:$0xff]  ;;  %v75_v42 = vld [vmem:[#allocation5 + $0x48] sm:$0xff]  ;;  %v645_v43 = vpack.c.bf16 %v107_v38, %v106_v37  ;;  %v93_v45 = vld [vmem:[#allocation5 + $0xd8] sm:$0xff] }
  0x43   :  { %638 = vmatprep.subr.bf16.mxu1 %v637_v25  ;;  %v108_v46 = vld [vmem:[#allocation5 + $0x150] sm:$0xff]  ;;  %v109_v47 = vld [vmem:[#allocation5 + $0x158] sm:$0xff]  ;;  %v615_v48 = vpack.c.bf16 %v75_v42, %v74_v41  ;;  %v617_v50 = vpack.c.bf16 %v93_v45, %v92_v44  ;;  %v62_v53 = vld [vmem:[#allocation2 + $0x10] sm:$0xff] }
  0x44   :  { %608 = vmatpush3.bf16.msra.mxu0 %v607_v30  ;;  %v925_v49 = vld [vmem:[#allocation2 + $0x8] sm:$0xff]  ;;  %v76_v51 = vld [vmem:[#allocation5 + $0x50] sm:$0xff]  ;;  %v649_v54 = vpack.c.bf16 %v109_v47, %v108_v46  ;;  %v94_v55 = vld [vmem:[#allocation5 + $0xe0] sm:$0xff]  ;;  %559 = vmatprep.mubr.f32.mxu1 %v62_v53 }
  0x45   :  { %610 = vmatprep.subr.bf16.mxu0 %v609_v31  ;;  %v77_v52 = vld [vmem:[#allocation5 + $0x58] sm:$0xff]  ;;  %v95_v56 = vld [vmem:[#allocation5 + $0xe8] sm:$0xff]  ;;  %178 = vmatprep.mubr.f32.mxu0 %v925_v49  ;;  %v110_v57 = vld [vmem:[#allocation5 + $0x160] sm:$0xff] }
  0x46   :  { %640 = vmatpush3.bf16.msra.mxu1 %v637_v25  ;;  %v111_v58 = vld [vmem:[#allocation5 + $0x168] sm:$0xff]  ;;  %v619_v59 = vpack.c.bf16 %v77_v52, %v76_v51  ;;  %v621_v60 = vpack.c.bf16 %v95_v56, %v94_v55  ;;  %v78_v61 = vld [vmem:[#allocation5 + $0x60] sm:$0xff]  ;;  %v96_v0 = vld [vmem:[#allocation5 + $0xf0] sm:$0xff] }
  0x47   :  { %642 = vmatprep.subr.bf16.mxu1 %v641_v34  ;;  %v79_v62 = vld [vmem:[#allocation5 + $0x68] sm:$0xff]  ;;  %v653_v63 = vpack.c.bf16 %v111_v58, %v110_v57  ;;  %v97_v1 = vld [vmem:[#allocation5 + $0xf8] sm:$0xff]  ;;  %v112_v2 = vld [vmem:[#allocation5 + $0x170] sm:$0xff] }
  0x48   :  { %612 = vmatpush3.bf16.msra.mxu0 %v611_v39  ;;  %v113_v3 = vld [vmem:[#allocation5 + $0x178] sm:$0xff]  ;;  %v623_v4 = vpack.c.bf16 %v79_v62, %v78_v61  ;;  %v625_v5 = vpack.c.bf16 %v97_v1, %v96_v0  ;;  %v80_v6 = vld [vmem:[#allocation5 + $0x70] sm:$0xff]  ;;  %v264_v9 = vld [vmem:[#allocation7] sm:$0xff] }
  0x49   :  { %614 = vmatprep.subr.bf16.mxu0 %v613_v40  ;;  %v81_v7 = vld [vmem:[#allocation5 + $0x78] sm:$0xff]  ;;  %v657_v8 = vpack.c.bf16 %v113_v3, %v112_v2  ;;  %v265_v10 = vld [vmem:[#allocation7 + $0x8] sm:$0xff]  ;;  %v266_v13 = vld [vmem:[#allocation7 + $0x10] sm:$0xff] }
  0x4a   :  { %644 = vmatpush3.bf16.msra.mxu1 %v641_v34  ;;  %v627_v11 = vpack.c.bf16 %v81_v7, %v80_v6  ;;  %v661_v12 = vpack.c.bf16 %v265_v10, %v264_v9  ;;  %v267_v14 = vld [vmem:[#allocation7 + $0x18] sm:$0xff]  ;;  %v60_v15 = vld [vmem:[#allocation2] sm:$0xff]  ;;  %v268_v19 = vld [vmem:[#allocation7 + $0x20] sm:$0xff] }
  0x4b   :  { %646 = vmatprep.subr.bf16.mxu1 %v645_v43  ;;  %v65_v16 = vld [vmem:[#allocation2 + $0x28] sm:$0xff]  ;;  %v665_v17 = vpack.c.bf16 %v267_v14, %v266_v13  ;;  %v64_v18 = vld [vmem:[#allocation2 + $0x20] sm:$0xff]  ;;  %v269_v20 = vld [vmem:[#allocation7 + $0x28] sm:$0xff] }
  0x4c   :  { %616 = vmatpush3.bf16.msra.mxu0 %v615_v48  ;;  %v63_v21 = vld [vmem:[#allocation2 + $0x18] sm:$0xff]  ;;  %v669_v22 = vpack.c.bf16 %v269_v20, %v268_v19  ;;  %v270_v23 = vld [vmem:[#allocation7 + $0x30] sm:$0xff]  ;;  %v271_v24 = vld [vmem:[#allocation7 + $0x38] sm:$0xff] }
  0x4d   :  { %618 = vmatprep.subr.bf16.mxu0 %v617_v50  ;;  %v673_v25 = vpack.c.bf16 %v271_v24, %v270_v23  ;;  %v272_v26 = vld [vmem:[#allocation7 + $0x40] sm:$0xff]  ;;  %v273_v27 = vld [vmem:[#allocation7 + $0x48] sm:$0xff]  ;;  %v274_v29 = vld [vmem:[#allocation7 + $0x50] sm:$0xff] }
  0x4e   :  { %648 = vmatpush3.bf16.msra.mxu1 %v645_v43  ;;  %v677_v28 = vpack.c.bf16 %v273_v27, %v272_v26  ;;  %v275_v30 = vld [vmem:[#allocation7 + $0x58] sm:$0xff]  ;;  %v276_v32 = vld [vmem:[#allocation7 + $0x60] sm:$0xff]  ;;  %v277_v33 = vld [vmem:[#allocation7 + $0x68] sm:$0xff] }
  0x4f   :  { %650 = vmatprep.subr.bf16.mxu1 %v649_v54  ;;  %v681_v31 = vpack.c.bf16 %v275_v30, %v274_v29  ;;  %v685_v34 = vpack.c.bf16 %v277_v33, %v276_v32  ;;  %v278_v35 = vld [vmem:[#allocation7 + $0x70] sm:$0xff]  ;;  %v279_v36 = vld [vmem:[#allocation7 + $0x78] sm:$0xff] }
  0x50   :  { %620 = vmatpush3.bf16.msra.mxu0 %v619_v59  ;;  %v689_v37 = vpack.c.bf16 %v279_v36, %v278_v35 }
  0x51   :  { %622 = vmatprep.subr.bf16.mxu0 %v621_v60 }
  0x52   :  { %652 = vmatpush3.bf16.msra.mxu1 %v649_v54 }
  0x53   :  { %654 = vmatprep.subr.bf16.mxu1 %v653_v63 }
  0x54   :  { %624 = vmatpush3.bf16.msra.mxu0 %v623_v4 }
  0x55   :  { %626 = vmatprep.subr.bf16.mxu0 %v625_v5 }
  0x56   :  { %656 = vmatpush3.bf16.msra.mxu1 %v653_v63 }
  0x57   :  { %658 = vmatprep.subr.bf16.mxu1 %v657_v8 }
  0x58   :  { %628 = vmatpush3.bf16.msra.mxu0 %v627_v11 }
  0x59   :  { %662 = vmatprep.subr.bf16.mxu0 %v661_v12 }
  0x5a   :  { %660 = vmatpush3.bf16.msra.mxu1 %v657_v8 }
  0x5b   :  { %179 = vmatmul.mubr.f32.vlgmr.msra.gmra.mrb[0].mxu0 %v60_v15 }
  0x5c   :  { %664 = vmatpush3.bf16.msra.mxu0 %v661_v12  ;;  %183 = vmatprep.mubr.f32.mxu0 %v64_v18 }
  0x5d   :  { %560 = vmatmul.mubr.f32.vlgmr.msra.gmra.mrb[0].mxu1 %v65_v16  ;;  %666 = vmatprep.subr.bf16.mxu0 %v665_v17 }
  0x5f   :  { %184 = vmatmul.mubr.f32.gmra.mrb[2].mxu0 %v63_v21 }
  0x60   :  { %668 = vmatpush3.bf16.msra.mxu0 %v665_v17  ;;  %594 = vmatprep.mubr.f32.mxu0 %v925_v49 }
  0x61   :  { %670 = vmatprep.subr.bf16.mxu0 %v669_v22 }
  0x64   :  { %672 = vmatpush3.bf16.msra.mxu0 %v669_v22 }
  0x65   :  { %674 = vmatprep.subr.bf16.mxu0 %v673_v25 }
  0x68   :  { %676 = vmatpush3.bf16.msra.mxu0 %v673_v25 }
  0x69   :  { %678 = vmatprep.subr.bf16.mxu0 %v677_v28 }
  0x6c   :  { %680 = vmatpush3.bf16.msra.mxu0 %v677_v28 }
  0x6d   :  { %682 = vmatprep.subr.bf16.mxu0 %v681_v31 }
  0x70   :  { %684 = vmatpush3.bf16.msra.mxu0 %v681_v31 }
  0x71   :  { %686 = vmatprep.subr.bf16.mxu0 %v685_v34 }
  0x74   :  { %688 = vmatpush3.bf16.msra.mxu0 %v685_v34 }
  0x75   :  { %690 = vmatprep.subr.bf16.mxu0 %v689_v37 }
  0x78   :  { %692 = vmatpush3.bf16.msra.mxu0 %v689_v37 }
  0x7b   :  { %595 = vmatmul.mubr.f32.vlgmr.msra.gmra.mrb[4].mxu0 %v64_v18 }
 0x12e   :  { %v485_v38 = vpop.f32.mrb[0].mxu0 }
 0x12f   :  { %v486_v39 = vpop.f32.mrb[1].mxu0 }
 0x130   :  { %v561_v40 = vpop.f32.mrb[0].mxu1  ;;  %v487_v41 = vadd.f32 %v486_v39, %v485_v38 }
 0x131   :  { %v255_v42 = vpop.f32.mrb[1].mxu1 }
 0x132   :  { %v256_v43 = vadd.f32 %v487_v41, %v255_v42  ;;  %v488_v44 = vpop.f32.mrb[2].mxu0 }
 0x133   :  { %v489_v45 = vpop.f32.mrb[3].mxu0 }
 0x134   :  { %355 = vst [vmem:[#allocation8] sm:$0xff] %v256_v43  ;;  %v490_v46 = vadd.f32 %v489_v45, %v488_v44  ;;  %v366_v48 = vmul.f32 %v256_v43, %v256_v43 }
 0x136   :  { %v261_v47 = vadd.f32 %v561_v40, %v490_v46 }
 0x138   :  { %v359_v49 = vadd.f32 %v261_v47, %v256_v43  ;;  %v367_v50 = vmul.f32 %v261_v47, %v261_v47  ;;  %356 = vst [vmem:[#allocation8 + $0x8] sm:$0xff] %v261_v47 }
 0x139   :  { %780 = shalt.err (!%p777_p0)
}
 0x13a   :  { %s781_s12 = scalar_lea.hbm %s974_s3, 256 }
 0x13b   :  { %p782_p1 = scmp.ne.s32.totalorder %s974_s3, %s781_s12  ;;  %p785_p2 = scmp.lt.u32.totalorder %s781_s12, %s974_s3 }
 0x13d   :  { %p787_p3 = pnand %p785_p2, %p782_p1 }
 0x13f   :  { %790 = shalt.err (!%p787_p3)
}
 0x140   :  { %417 = dma.vmem_to_hbm [thread:$0]  %s412_s8, 256, %s974_s3, [#allocation4], %s844_s28, %s844_s28, %s845_s29   ;;  %v360_v51 = vrot.slane %v359_v49, 4  ;;  %v368_v52 = vadd.f32 %v367_v50, %v366_v48  ;;  %vm391_vm0 = vcmask 1040384  }
 0x141   :  { %s851_s18 = smov [#allocation9]  }
 0x142   :  { %v361_v53 = vadd.f32 %v360_v51, %v359_v49  ;;  %v369_v54 = vrot.slane %v368_v52, 4  ;;  %s423_s19 = sshll.u32 %s851_s18, 4  ;;  %s424_s19 = int_to_ptr.vmem [resolvable:$true] %s423_s19 }
 0x143   :  { %s791_s3 = scalar_lea.vmem %s424_s19, 256  ;;  %p796_p5 = scmp.lt.s32.totalorder %s424_s19, %s424_s19 }
 0x144   :  { %v362_v55 = vrot.slane %v361_v53, 2  ;;  %v370_v56 = vadd.f32 %v369_v54, %v368_v52  ;;  %p792_p4 = scmp.ne.s32.totalorder %s424_s19, %s791_s3  ;;  %p797_p6 = scmp.lt.s32.totalorder %s791_s3, %s791_s3 }
 0x146   :  { %v363_v57 = vadd.f32 %v362_v55, %v361_v53  ;;  %v371_v58 = vrot.slane %v370_v56, 2  ;;  %p798_p7 = por %p797_p6, %p796_p5 }
 0x148   :  { %v364_v59 = vrot.slane %v363_v57, 1  ;;  %v372_v60 = vadd.f32 %v371_v58, %v370_v56  ;;  %p799_p8 = pnand %p798_p7, %p792_p4 }
 0x14a   :  { %v373_v61 = vrot.slane %v372_v60, 1  ;;  %v365_v62 = vadd.f32 %v364_v59, %v363_v57 }
 0x14c   :  { %v374_v63 = vadd.f32 %v373_v61, %v372_v60 }
 0x14e   :  { %v392_v0 = vsel %vm391_vm0, %v365_v62, %v374_v63  ;;  %v596_v1 = vpop.f32.mrb[4].mxu0 }
 0x14f   :  { %v383_v2 = vmul.f32 %v596_v1, %v596_v1  ;;  %358 = vst [vmem:[#allocation9 + $0x8] sm:$0xff] %v596_v1  ;;  %v346_v3 = vpop.f32.mrb[5].mxu0 }
 0x150   :  { %357 = vst [vmem:[#allocation9] sm:$0xff] %v346_v3  ;;  %v375_v4 = vadd.f32 %v596_v1, %v346_v3  ;;  %v382_v5 = vmul.f32 %v346_v3, %v346_v3 }
 0x151   :  { %802 = shalt.err (!%p799_p8)
}
 0x152   :  { %s803_s22 = scalar_lea.hbm %s975_s4, 256 }
 0x153   :  { %p804_p9 = scmp.ne.s32.totalorder %s975_s4, %s803_s22  ;;  %p807_p10 = scmp.lt.u32.totalorder %s803_s22, %s975_s4 }
 0x155   :  { %p809_p11 = pnand %p807_p10, %p804_p9 }
 0x157   :  { %812 = shalt.err (!%p809_p11)
}
 0x158   :  { %429 = dma.vmem_to_hbm [thread:$0]  %s424_s19, 256, %s975_s4, [#allocation10], %s844_s28, %s844_s28, %s845_s29   ;;  %v376_v6 = vrot.slane %v375_v4, 4  ;;  %v384_v7 = vadd.f32 %v383_v2, %v382_v5  ;;  %vm393_vm1 = vcmask 1041408   ;;  %vm395_vm2 = vcmask 1042432  }
 0x159   :  { %vm397_vm3 = vcmask 1043456   ;;  %vm399_vm4 = vcmask 1044480   ;;  %vm401_vm5 = vcmask 1045504   ;;  %s852_s4 = smov [#allocation11]   ;;  %vm403_vm6 = vcmask 1046528  }
 0x15a   :  { %v377_v8 = vadd.f32 %v376_v6, %v375_v4  ;;  %v385_v9 = vrot.slane %v384_v7, 4  ;;  %s436_s28 = sshll.u32 %s852_s4, 4  ;;  %s437_s28 = int_to_ptr.vmem [resolvable:$true] %s436_s28 }
 0x15b   :  { %s813_s29 = scalar_lea.vmem %s437_s28, 128  ;;  %p818_p13 = scmp.lt.s32.totalorder %s437_s28, %s437_s28 }
 0x15c   :  { %v378_v10 = vrot.slane %v377_v8, 2  ;;  %v386_v11 = vadd.f32 %v385_v9, %v384_v7  ;;  %p814_p12 = scmp.ne.s32.totalorder %s437_s28, %s813_s29  ;;  %p819_p0 = scmp.lt.s32.totalorder %s813_s29, %s813_s29 }
 0x15e   :  { %v379_v12 = vadd.f32 %v378_v10, %v377_v8  ;;  %v387_v13 = vrot.slane %v386_v11, 2  ;;  %p820_p1 = por %p819_p0, %p818_p13 }
 0x160   :  { %v380_v14 = vrot.slane %v379_v12, 1  ;;  %v388_v15 = vadd.f32 %v387_v13, %v386_v11  ;;  %p821_p2 = pnand %p820_p1, %p814_p12 }
 0x162   :  { %v381_v16 = vadd.f32 %v380_v14, %v379_v12  ;;  %v389_v17 = vrot.slane %v388_v15, 1 }
 0x164   :  { %v390_v18 = vadd.f32 %v389_v17, %v388_v15  ;;  %v394_v19 = vsel %vm393_vm1, %v392_v0, %v381_v16 }
 0x166   :  { %v396_v20 = vsel %vm395_vm2, %v394_v19, %v390_v18 }
 0x167   :  { %v398_v21 = vsel %vm397_vm3, %v396_v20, 0.0 }
 0x168   :  { %v400_v22 = vsel %vm399_vm4, %v398_v21, 0.0 }
 0x169   :  { %v402_v23 = vsel %vm401_vm5, %v400_v22, 0.0 }
 0x16a   :  { %v404_v24 = vsel %vm403_vm6, %v402_v23, 0.0 }
 0x16b   :  { %405 = vst [vmem:[#allocation11] sm:$0xff] %v404_v24 }
 0x16c   :  { %824 = shalt.err (!%p821_p2)
}
 0x16d   :  { %s825_s7 = scalar_lea.hbm %s976_s5, 128 }
 0x16e   :  { %p826_p3 = scmp.ne.s32.totalorder %s976_s5, %s825_s7  ;;  %p829_p4 = scmp.lt.u32.totalorder %s825_s7, %s976_s5 }
 0x170   :  { %p831_p5 = pnand %p829_p4, %p826_p3 }
 0x172   :  { %834 = shalt.err (!%p831_p5)
}
 0x173   :  { %439 = dma.vmem_to_hbm [thread:$0]  %s437_s28, 128, %s976_s5, [#allocation10]  }
 0x174   :  { %839 = dma.done.wait [#allocation4], 256  }
 0x175   :  { %840 = vsyncadd [#allocation4], 4294967040 }
 0x176   :  { %841 = dma.done.wait [#allocation10], 384  }
 0x177   :  { %842 = vsyncadd [#allocation10], 4294966912 }
 0x178   :  { %449 = vsyncpa [#allocation3], 1 }
 0x179   :  { %450 = vsyncpa [#allocation6], 1 }
 0x17a   :  { %451 = vsyncpa [#allocation4], 1 }
 0x17b   :  { %452 = vsyncpa [#allocation10], 1 }

</bundles_post_ra>
